<compile_context>
chip_gen: v5e
topology: v5e:2x2
jax: 0.10.0
libtpu: 0.0.40
codegen_flags: <defaults>
</compile_context>

<pallas_src>
import math
import functools

import jax
import jax.numpy as jnp
from jax.experimental import pallas as pl
from jax.experimental.pallas import tpu as pltpu


# ----------------------------------------------------------------------------- kernel
def _xattn_kernel(img_ref, txt_ref, wq_ref, bq_ref, wk_ref, bk_ref, wv_ref, bv_ref,
                  o_ref, *, nb, lq, lt, hidden_dim):
    di = img_ref.shape[-1]
    dt = txt_ref.shape[-1]

    # Fold the NB batch block into the matmul M dimension: (NB*Lq, Di) @ (Di, H).
    # Lq/Lt are multiples of 8, so these reshapes are sublane-major merges (no relayout).
    img2 = img_ref[...].reshape(nb * lq, di)   # bf16
    txt2 = txt_ref[...].reshape(nb * lt, dt)   # bf16

    # Projections: bf16 operands, f32 accumulation on the MXU.
    q2 = jnp.dot(img2, wq_ref[...], preferred_element_type=jnp.float32) + bq_ref[...]
    k2 = jnp.dot(txt2, wk_ref[...], preferred_element_type=jnp.float32) + bk_ref[...]
    v2 = jnp.dot(txt2, wv_ref[...], preferred_element_type=jnp.float32) + bv_ref[...]

    q = q2.reshape(nb, lq, hidden_dim).astype(jnp.bfloat16)
    k = k2.reshape(nb, lt, hidden_dim).astype(jnp.bfloat16)
    v = v2.reshape(nb, lt, hidden_dim).astype(jnp.bfloat16)

    # Scaled dot-product attention, batched over the NB block (bf16 MXU, f32 acc).
    inv_sqrt_dk = 1.0 / math.sqrt(float(hidden_dim))
    scores = jnp.einsum("bqh,bkh->bqk", q, k,
                        preferred_element_type=jnp.float32) * inv_sqrt_dk
    scores = scores - scores.max(axis=-1, keepdims=True)
    p = jnp.exp(scores)
    # Approx reciprocal runs on the EUP (free bundle slot); ~1e-3 rel error, far
    # below the bf16 error budget of this kernel.
    attn = p * pl.reciprocal(p.sum(axis=-1, keepdims=True), approx=True)
    attended = jnp.einsum("bqk,bkd->bqd", attn.astype(jnp.bfloat16), v,
                          preferred_element_type=jnp.float32)

    # TODO(synk): a lane-dense (NB, Lq*H) store would further cut masked-vst work when
    # H < 128, but the minor-dim-merging reshape is not reliably lowerable by Mosaic;
    # the bf16 output already halves the masked-store bytes, so keep (NB, Lq, H).
    o_ref[...] = attended.astype(o_ref.dtype)


# --------------------------------------------------------------------------- heuristics
def _tpu_generation():
    """Return (tensorcores_per_chip, vmem_live_budget_bytes, vmem_limit_bytes)."""
    kind = ""
    try:
        kind = jax.devices()[0].device_kind.lower()
    except Exception:
        pass
    if "v7" in kind or "7x" in kind:
        # v7x: 2 TCs/chip, only 64 MiB physical VMEM per TC.
        return 2, 40 * 1024 * 1024, 48 * 1024 * 1024
    # v5e / v6e (and unknown): 1 TC, 128 MiB physical VMEM (default scoped 16/32 MiB).
    return 1, 64 * 1024 * 1024, 96 * 1024 * 1024


def _vmem_bytes_per_step(nb, lq, lt, di, dt, h):
    bf16, f32 = 2, 4
    blocks = 2 * nb * (lq * di + lt * dt + lq * h) * bf16           # double-buffered I/O
    weights = 2 * ((di * h + 2 * dt * h) * bf16 + 3 * h * f32)      # resident weights/biases
    interm = nb * (2 * lq * h + 2 * lt * h + 2 * lq * lt) * f32     # q,att,k,v,scores,p (f32)
    return blocks + weights + 2 * interm                            # 2x headroom for relayouts


def _choose_batch_block(batch, lq, lt, di, dt, h):
    """Generation-aware NB: feed the MXU a real M dimension, fit VMEM, balance TCs."""
    num_tc, vmem_budget, vmem_limit = _tpu_generation()
    row_target = 512                                    # NB*Lq target for the projections
    nb = max(1, min(batch, -(-row_target // max(lq, 1))))
    if num_tc >= 2:
        # Keep at least one grid step per TensorCore (megacore sharding).
        nb = max(1, min(nb, -(-batch // num_tc)))
    # Cap NB so the per-step live set fits this generation's VMEM budget.
    while nb > 1 and _vmem_bytes_per_step(nb, lq, lt, di, dt, h) > vmem_budget:
        nb = (nb + 1) // 2
    return nb, num_tc, vmem_limit


# ----------------------------------------------------------------------------- wrapper
def cross_modality_attention(image_features, text_features,
                             wq, bq, wk, bk, wv, bv, *,
                             batch_block=None, out_dtype=jnp.bfloat16):
    B, Lq, Di = image_features.shape
    _, Lt, Dt = text_features.shape
    H = wq.shape[1]
    compute_dtype = jnp.bfloat16

    # Keep Lq a multiple of 8 so in-kernel (nb,Lq,.) <-> (nb*Lq,.) reshapes stay
    # relayout-free.  Padded query rows are computed and sliced off (safe).
    lq_pad = (-Lq) % 8
    if lq_pad:
        image_features = jnp.pad(image_features, ((0, 0), (0, lq_pad), (0, 0)))
    Lq_p = Lq + lq_pad
    # NOTE: padding Lt would add fake keys into the softmax and needs masking; the
    # example Lt is already a multiple of 8.

    nb_auto, num_tc, vmem_limit = _choose_batch_block(B, Lq_p, Lt, Di, Dt, H)
    nb = batch_block if batch_block is not None else nb_auto

    G = -(-B // nb)
    if num_tc >= 2 and G % num_tc:
        G += num_tc - (G % num_tc)        # even G on v7x -> equal work per TensorCore
    B_pad = G * nb
    if B_pad != B:
        pad = B_pad - B
        image_features = jnp.pad(image_features, ((0, pad), (0, 0), (0, 0)))
        text_features = jnp.pad(text_features, ((0, pad), (0, 0), (0, 0)))

    # bf16 at the pallas_call boundary (halves DMA bytes); biases stay f32 (tiny,
    # added post-accumulation).
    img = image_features.astype(compute_dtype)
    txt = text_features.astype(compute_dtype)
    wq_c, wk_c, wv_c = (w.astype(compute_dtype) for w in (wq, wk, wv))
    bq_c, bk_c, bv_c = (b.reshape(1, H).astype(jnp.float32) for b in (bq, bk, bv))

    flops = 2 * B_pad * (Lq_p * Di * H + 2 * Lt * Dt * H + 2 * Lq_p * Lt * H)
    bytes_accessed = (
        (img.size + txt.size + wq_c.size + wk_c.size + wv_c.size) * 2
        + (bq_c.size + bk_c.size + bv_c.size) * 4
        + B_pad * Lq_p * H * jnp.dtype(out_dtype).itemsize)
    cost = pl.CostEstimate(flops=flops,
                           transcendentals=B_pad * Lq_p * Lt,
                           bytes_accessed=bytes_accessed)

    kernel = functools.partial(_xattn_kernel, nb=nb, lq=Lq_p, lt=Lt, hidden_dim=H)

    out = pl.pallas_call(
        kernel,
        out_shape=jax.ShapeDtypeStruct((B_pad, Lq_p, H), out_dtype),
        grid_spec=pltpu.PrefetchScalarGridSpec(
            num_scalar_prefetch=0,
            grid=(G,),
            in_specs=[
                pl.BlockSpec((nb, Lq_p, Di), lambda b: (b, 0, 0)),   # image block
                pl.BlockSpec((nb, Lt, Dt), lambda b: (b, 0, 0)),     # text block
                # Weights/biases: constant index_map -> resident across grid steps.
                pl.BlockSpec((Di, H), lambda b: (0, 0)),             # Wq
                pl.BlockSpec((1, H), lambda b: (0, 0)),              # bq
                pl.BlockSpec((Dt, H), lambda b: (0, 0)),             # Wk
                pl.BlockSpec((1, H), lambda b: (0, 0)),              # bk
                pl.BlockSpec((Dt, H), lambda b: (0, 0)),             # Wv
                pl.BlockSpec((1, H), lambda b: (0, 0)),              # bv
            ],
            out_specs=pl.BlockSpec((nb, Lq_p, H), lambda b: (b, 0, 0)),
        ),
        compiler_params=pltpu.CompilerParams(
            dimension_semantics=("parallel",),
            vmem_limit_bytes=vmem_limit),
        cost_estimate=cost,
    )(img, txt, wq_c, bq_c, wk_c, bk_c, wv_c, bv_c)

    return out[:B, :Lq]


# --------------------------------------------------------------------------- reference
def _reference(image_features, text_features, wq, bq, wk, bk, wv, bv, cast_dtype=None):
    if cast_dtype is not None:
        c = lambda a: a.astype(cast_dtype).astype(jnp.float32)
        image_features, text_features = c(image_features), c(text_features)
        wq, wk, wv = c(wq), c(wk), c(wv)
    H = wq.shape[1]
    q = image_features @ wq + bq
    k = text_features @ wk + bk
    v = text_features @ wv + bv
    scores = jnp.einsum("bqh,bkh->bqk", q, k) / jnp.sqrt(jnp.float32(H))
    w = jax.nn.softmax(scores, axis=-1)
    return jnp.einsum("bqk,bkh->bqh", w, v)


if __name__ == "__main__":
    # Small deterministic example (B=5 exercises the padding / grid heuristics).
    B, Lq, Lt = 5, 8, 8
    Di, Dt, H = 16, 24, 32

    key = jax.random.PRNGKey(0)
    k_img, k_txt, k_wq, k_wk, k_wv, k_bq, k_bk, k_bv = jax.random.split(key, 8)

    image_features = jax.random.normal(k_img, (B, Lq, Di), dtype=jnp.float32)
    text_features = jax.random.normal(k_txt, (B, Lt, Dt), dtype=jnp.float32)

    # Linear: y = x @ W + b, with W stored as (in_dim, hidden).
    wq = jax.random.normal(k_wq, (Di, H), dtype=jnp.float32) / math.sqrt(Di)
    wk = jax.random.normal(k_wk, (Dt, H), dtype=jnp.float32) / math.sqrt(Dt)
    wv = jax.random.normal(k_wv, (Dt, H), dtype=jnp.float32) / math.sqrt(Dt)
    bq = jax.random.normal(k_bq, (1, H), dtype=jnp.float32) * 0.01
    bk = jax.random.normal(k_bk, (1, H), dtype=jnp.float32) * 0.01
    bv = jax.random.normal(k_bv, (1, H), dtype=jnp.float32) * 0.01

    out = cross_modality_attention(image_features, text_features,
                                   wq, bq, wk, bk, wv, bv)
    out = jax.block_until_ready(out)
    assert out.shape == (B, Lq, H)
    out_f32 = out.astype(jnp.float32)

    # The kernel deliberately runs bf16 on the MXU (bf16 boundary I/O, bf16 QK^T / PV
    # operands, bf16 output) with f32 accumulation and an approx EUP reciprocal in the
    # softmax.  Check against (a) a reference with the same boundary precision and
    # (b) the pure-f32 reference with a looser end-to-end budget.
    ref_bf16_io = _reference(image_features, text_features, wq, bq, wk, bk, wv, bv,
                             cast_dtype=jnp.bfloat16)
    assert jnp.allclose(out_f32, ref_bf16_io, atol=7.5e-2, rtol=7.5e-2), \
        "mismatch vs matched-precision reference"
    ref_f32 = _reference(image_features, text_features, wq, bq, wk, bk, wv, bv)
    assert jnp.allclose(out_f32, ref_f32, atol=1.5e-1, rtol=1.5e-1), \
        "mismatch vs f32 reference"

    print("KERNEL_OK")
</pallas_src>

<mosaic_0001>
module attributes {stable_mosaic.version = 11 : i64} {
  func.func @_xattn_kernel(%arg0: i32, %arg1: memref<5x8x16xbf16, #tpu.memory_space<vmem>>, %arg2: memref<5x8x24xbf16, #tpu.memory_space<vmem>>, %arg3: memref<16x32xbf16, #tpu.memory_space<vmem>>, %arg4: memref<1x32xf32, #tpu.memory_space<vmem>>, %arg5: memref<24x32xbf16, #tpu.memory_space<vmem>>, %arg6: memref<1x32xf32, #tpu.memory_space<vmem>>, %arg7: memref<24x32xbf16, #tpu.memory_space<vmem>>, %arg8: memref<1x32xf32, #tpu.memory_space<vmem>>, %arg9: memref<5x8x32xbf16, #tpu.memory_space<vmem>>) attributes {dimension_semantics = [#tpu.dimension_semantics<parallel>], iteration_bounds = array<i64: 1>, scalar_prefetch = 0 : i64, scratch_operands = 0 : i64, tpu.core_type = #tpu.core_type<tc>, window_params = [{transform_indices = @transform_0, window_bounds = array<i64: 5, 8, 16>}, {transform_indices = @transform_1, window_bounds = array<i64: 5, 8, 24>}, {pipeline_mode = #tpu.pipeline_mode<synchronous>, transform_indices = @transform_2, window_bounds = array<i64: 16, 32>}, {pipeline_mode = #tpu.pipeline_mode<synchronous>, transform_indices = @transform_3, window_bounds = array<i64: 1, 32>}, {pipeline_mode = #tpu.pipeline_mode<synchronous>, transform_indices = @transform_4, window_bounds = array<i64: 24, 32>}, {pipeline_mode = #tpu.pipeline_mode<synchronous>, transform_indices = @transform_5, window_bounds = array<i64: 1, 32>}, {pipeline_mode = #tpu.pipeline_mode<synchronous>, transform_indices = @transform_6, window_bounds = array<i64: 24, 32>}, {pipeline_mode = #tpu.pipeline_mode<synchronous>, transform_indices = @transform_7, window_bounds = array<i64: 1, 32>}, {transform_indices = @transform_8, window_bounds = array<i64: 5, 8, 32>}]} {
    %c0 = arith.constant 0 : index
    %c0_0 = arith.constant 0 : index
    %c0_1 = arith.constant 0 : index
    %0 = vector.load %arg1[%c0, %c0_0, %c0_1] : memref<5x8x16xbf16, #tpu.memory_space<vmem>>, vector<5x8x16xbf16>
    %1 = vector.shape_cast %0 : vector<5x8x16xbf16> to vector<40x16xbf16>
    %c0_2 = arith.constant 0 : index
    %c0_3 = arith.constant 0 : index
    %c0_4 = arith.constant 0 : index
    %2 = vector.load %arg2[%c0_2, %c0_3, %c0_4] : memref<5x8x24xbf16, #tpu.memory_space<vmem>>, vector<5x8x24xbf16>
    %3 = vector.shape_cast %2 : vector<5x8x24xbf16> to vector<40x24xbf16>
    %c0_5 = arith.constant 0 : index
    %c0_6 = arith.constant 0 : index
    %4 = vector.load %arg3[%c0_5, %c0_6] : memref<16x32xbf16, #tpu.memory_space<vmem>>, vector<16x32xbf16>
    %cst = arith.constant dense<0.000000e+00> : vector<40x32xf32>
    %5 = tpu.matmul %1, %4, %cst {dimension_numbers = #tpu.dot_dimension_numbers<[1], [0], [0], [1], [0, 0, 1, 1], [], []>} : vector<40x16xbf16>, vector<16x32xbf16>, vector<40x32xf32> -> vector<40x32xf32>
    %c0_7 = arith.constant 0 : index
    %c0_8 = arith.constant 0 : index
    %6 = vector.load %arg4[%c0_7, %c0_8] : memref<1x32xf32, #tpu.memory_space<vmem>>, vector<1x32xf32>
    %7 = vector.broadcast %6 : vector<1x32xf32> to vector<40x32xf32>
    %8 = arith.addf %5, %7 : vector<40x32xf32>
    %c0_9 = arith.constant 0 : index
    %c0_10 = arith.constant 0 : index
    %9 = vector.load %arg5[%c0_9, %c0_10] : memref<24x32xbf16, #tpu.memory_space<vmem>>, vector<24x32xbf16>
    %cst_11 = arith.constant dense<0.000000e+00> : vector<40x32xf32>
    %10 = tpu.matmul %3, %9, %cst_11 {dimension_numbers = #tpu.dot_dimension_numbers<[1], [0], [0], [1], [0, 0, 1, 1], [], []>} : vector<40x24xbf16>, vector<24x32xbf16>, vector<40x32xf32> -> vector<40x32xf32>
    %c0_12 = arith.constant 0 : index
    %c0_13 = arith.constant 0 : index
    %11 = vector.load %arg6[%c0_12, %c0_13] : memref<1x32xf32, #tpu.memory_space<vmem>>, vector<1x32xf32>
    %12 = vector.broadcast %11 : vector<1x32xf32> to vector<40x32xf32>
    %13 = arith.addf %10, %12 : vector<40x32xf32>
    %c0_14 = arith.constant 0 : index
    %c0_15 = arith.constant 0 : index
    %14 = vector.load %arg7[%c0_14, %c0_15] : memref<24x32xbf16, #tpu.memory_space<vmem>>, vector<24x32xbf16>
    %cst_16 = arith.constant dense<0.000000e+00> : vector<40x32xf32>
    %15 = tpu.matmul %3, %14, %cst_16 {dimension_numbers = #tpu.dot_dimension_numbers<[1], [0], [0], [1], [0, 0, 1, 1], [], []>} : vector<40x24xbf16>, vector<24x32xbf16>, vector<40x32xf32> -> vector<40x32xf32>
    %c0_17 = arith.constant 0 : index
    %c0_18 = arith.constant 0 : index
    %16 = vector.load %arg8[%c0_17, %c0_18] : memref<1x32xf32, #tpu.memory_space<vmem>>, vector<1x32xf32>
    %17 = vector.broadcast %16 : vector<1x32xf32> to vector<40x32xf32>
    %18 = arith.addf %15, %17 : vector<40x32xf32>
    %19 = vector.shape_cast %8 : vector<40x32xf32> to vector<5x8x32xf32>
    %20 = arith.truncf %19 : vector<5x8x32xf32> to vector<5x8x32xbf16>
    %21 = vector.shape_cast %13 : vector<40x32xf32> to vector<5x8x32xf32>
    %22 = arith.truncf %21 : vector<5x8x32xf32> to vector<5x8x32xbf16>
    %23 = vector.shape_cast %18 : vector<40x32xf32> to vector<5x8x32xf32>
    %24 = arith.truncf %23 : vector<5x8x32xf32> to vector<5x8x32xbf16>
    "tpu.trace_start"() <{level = 10 : i32, message = "bqh,bkh->bqk"}> : () -> ()
    %cst_19 = arith.constant dense<0.000000e+00> : vector<5x8x8xf32>
    %25 = tpu.matmul %20, %22, %cst_19 {dimension_numbers = #tpu.dot_dimension_numbers<[2], [2], [1], [1], [0, 0, 0, 1, 1, 1], [0], [0]>} : vector<5x8x32xbf16>, vector<5x8x32xbf16>, vector<5x8x8xf32> -> vector<5x8x8xf32>
    "tpu.trace_stop"() : () -> ()
    %cst_20 = arith.constant 0.176776692 : f32
    %26 = vector.broadcast %cst_20 : f32 to vector<5x8x8xf32>
    %27 = arith.mulf %25, %26 : vector<5x8x8xf32>
    %cst_21 = arith.constant dense<0xFF800000> : vector<5x8xf32>
    %28 = vector.multi_reduction <maximumf>, %27, %cst_21 [2] : vector<5x8x8xf32> to vector<5x8xf32>
    %29 = vector.shape_cast %28 : vector<5x8xf32> to vector<5x8x1xf32>
    %30 = vector.broadcast %29 : vector<5x8x1xf32> to vector<5x8x8xf32>
    %31 = arith.subf %27, %30 : vector<5x8x8xf32>
    %32 = math.exp %31 : vector<5x8x8xf32>
    %cst_22 = arith.constant dense<0.000000e+00> : vector<5x8xf32>
    %33 = vector.multi_reduction <add>, %32, %cst_22 [2] : vector<5x8x8xf32> to vector<5x8xf32>
    %34 = vector.shape_cast %33 : vector<5x8xf32> to vector<5x8x1xf32>
    %35 = tpu.reciprocal %34 {approx = true} : vector<5x8x1xf32> -> vector<5x8x1xf32>
    %36 = vector.broadcast %35 : vector<5x8x1xf32> to vector<5x8x8xf32>
    %37 = arith.mulf %32, %36 : vector<5x8x8xf32>
    %38 = arith.truncf %37 : vector<5x8x8xf32> to vector<5x8x8xbf16>
    "tpu.trace_start"() <{level = 10 : i32, message = "bqk,bkd->bqd"}> : () -> ()
    %cst_23 = arith.constant dense<0.000000e+00> : vector<5x8x32xf32>
    %39 = tpu.matmul %38, %24, %cst_23 {dimension_numbers = #tpu.dot_dimension_numbers<[2], [1], [1], [2], [0, 0, 0, 1, 1, 2], [0], [0]>} : vector<5x8x8xbf16>, vector<5x8x32xbf16>, vector<5x8x32xf32> -> vector<5x8x32xf32>
    "tpu.trace_stop"() : () -> ()
    %40 = arith.truncf %39 : vector<5x8x32xf32> to vector<5x8x32xbf16>
    %c0_24 = arith.constant 0 : index
    %c0_25 = arith.constant 0 : index
    %c0_26 = arith.constant 0 : index
    %41 = vector.load %arg9[%c0_24, %c0_25, %c0_26] : memref<5x8x32xbf16, #tpu.memory_space<vmem>>, vector<5x8x32xbf16>
    tpu.vector_store %arg9[%c0_24, %c0_25, %c0_26], %40 {strides = array<i32>} : memref<5x8x32xbf16, #tpu.memory_space<vmem>>, vector<5x8x32xbf16>,
    return
  }
  func.func @transform_0(%arg0: i32) -> (i32, i32, i32) {
    %c0_i32 = arith.constant 0 : i32
    %c0_i32_0 = arith.constant 0 : i32
    %c0_i32_1 = arith.constant 0 : i32
    return %arg0, %c0_i32, %c0_i32_0 : i32, i32, i32
  }
  func.func @transform_1(%arg0: i32) -> (i32, i32, i32) {
    %c0_i32 = arith.constant 0 : i32
    %c0_i32_0 = arith.constant 0 : i32
    %c0_i32_1 = arith.constant 0 : i32
    return %arg0, %c0_i32, %c0_i32_0 : i32, i32, i32
  }
  func.func @transform_2(%arg0: i32) -> (i32, i32) {
    %c0_i32 = arith.constant 0 : i32
    %c0_i32_0 = arith.constant 0 : i32
    %c0_i32_1 = arith.constant 0 : i32
    return %c0_i32, %c0_i32_0 : i32, i32
  }
  func.func @transform_3(%arg0: i32) -> (i32, i32) {
    %c0_i32 = arith.constant 0 : i32
    %c0_i32_0 = arith.constant 0 : i32
    %c0_i32_1 = arith.constant 0 : i32
    return %c0_i32, %c0_i32_0 : i32, i32
  }
  func.func @transform_4(%arg0: i32) -> (i32, i32) {
    %c0_i32 = arith.constant 0 : i32
    %c0_i32_0 = arith.constant 0 : i32
    %c0_i32_1 = arith.constant 0 : i32
    return %c0_i32, %c0_i32_0 : i32, i32
  }
  func.func @transform_5(%arg0: i32) -> (i32, i32) {
    %c0_i32 = arith.constant 0 : i32
    %c0_i32_0 = arith.constant 0 : i32
    %c0_i32_1 = arith.constant 0 : i32
    return %c0_i32, %c0_i32_0 : i32, i32
  }
  func.func @transform_6(%arg0: i32) -> (i32, i32) {
    %c0_i32 = arith.constant 0 : i32
    %c0_i32_0 = arith.constant 0 : i32
    %c0_i32_1 = arith.constant 0 : i32
    return %c0_i32, %c0_i32_0 : i32, i32
  }
  func.func @transform_7(%arg0: i32) -> (i32, i32) {
    %c0_i32 = arith.constant 0 : i32
    %c0_i32_0 = arith.constant 0 : i32
    %c0_i32_1 = arith.constant 0 : i32
    return %c0_i32, %c0_i32_0 : i32, i32
  }
  func.func @transform_8(%arg0: i32) -> (i32, i32, i32) {
    %c0_i32 = arith.constant 0 : i32
    %c0_i32_0 = arith.constant 0 : i32
    %c0_i32_1 = arith.constant 0 : i32
    return %arg0, %c0_i32, %c0_i32_0 : i32, i32, i32
  }
}

</mosaic_0001>

<bundles_post_ra>
// kernel: tpu_custom_call.1
= control target key start
LH: loop header
LB: loop body
LE: loop exit
PB: predicated region body
PF: predicated region fallthrough
CT: control target
= control target key end

     0   :  { %13 = vsyncpa [#allocation3], 0  ;;  %s982_s0 = inlined_call_operand.hbm [shape: bf16[5,8,16], index: 0, kind: input, shape index: {}]   ;;  %s983_s1 = inlined_call_operand.hbm [shape: bf16[5,8,24], index: 1, kind: input, shape index: {}]   ;;  %s984_s2 = inlined_call_operand.hbm [shape: bf16[16,32], index: 2, kind: input, shape index: {}]   ;;  %s985_s3 = inlined_call_operand.vmem [shape: f32[1,32], index: 3, kind: input, shape index: {}]   ;;  %s986_s4 = inlined_call_operand.hbm [shape: bf16[24,32], index: 4, kind: input, shape index: {}]   ;;  %s987_s5 = inlined_call_operand.vmem [shape: f32[1,32], index: 5, kind: input, shape index: {}]   ;;  %s988_s6 = inlined_call_operand.hbm [shape: bf16[24,32], index: 6, kind: input, shape index: {}]   ;;  %s989_s7 = inlined_call_operand.vmem [shape: f32[1,32], index: 7, kind: input, shape index: {}]   ;;  %s990_s8 = inlined_call_operand.hbm [shape: bf16[5,8,32], index: 8, kind: output, shape index: {}]  }
   0x1   :  { %14 = vsyncpa [#allocation6], 0 }
   0x2   :  { %15 = vsyncpa [#allocation9], 0 }
   0x3   :  { %16 = vsyncpa [#allocation4], 0  ;;  %s34_s29 = sshll.u32 %s983_s1, 4  ;;  %s826_s30 = smov [#allocation5]   ;;  %s35_s29 = int_to_ptr.hbm [resolvable:$true] %s34_s29 }
   0x4   :  { %s36_s9 = sshll.u32 %s826_s30, 4  ;;  %s62_s12 = sshll.u32 %s986_s4, 4  ;;  %s37_s9 = int_to_ptr.vmem [resolvable:$true] %s36_s9  ;;  %s63_s12 = int_to_ptr.hbm [resolvable:$true] %s62_s12 }
   0x5   :  { %s827_s13 = smov 64   ;;  %s828_s14 = smov 4  }
   0x6   :  { %42 = dma.hbm_to_vmem [thread:$0]  %s35_s29, 320, %s37_s9, [#allocation6], %s827_s13, %s827_s13, %s828_s14  }
   0x7   :  { %s829_s15 = smov [#allocation8]   ;;  %s21_s1 = sshll.u32 %s982_s0, 4  ;;  %s22_s1 = int_to_ptr.hbm [resolvable:$true] %s21_s1 }
   0x8   :  { %s64_s16 = sshll.u32 %s829_s15, 4  ;;  %s47_s20 = sshll.u32 %s984_s2, 4  ;;  %s65_s16 = int_to_ptr.vmem [resolvable:$true] %s64_s16  ;;  %s48_s20 = int_to_ptr.hbm [resolvable:$true] %s47_s20 }
   0x9   :  { %70 = dma.hbm_to_vmem [thread:$0]  %s63_s12, 192, %s65_s16, [#allocation9], %s827_s13, %s827_s13, %s828_s14  }
   0xa   :  { %s830_s21 = smov [#allocation2]   ;;  %s831_s23 = smov [#allocation7]  }
   0xb   :  { %s23_s22 = sshll.u32 %s830_s21, 4  ;;  %s49_s0 = sshll.u32 %s831_s23, 4  ;;  %s24_s22 = int_to_ptr.vmem [resolvable:$true] %s23_s22  ;;  %s50_s0 = int_to_ptr.vmem [resolvable:$true] %s49_s0 }
   0xc   :  { %29 = dma.hbm_to_vmem [thread:$0]  %s22_s1, 320, %s24_s22, [#allocation3], %s827_s13, %s827_s13, %s828_s14  }
   0xd   :  { %s77_s26 = sshll.u32 %s988_s6, 4  ;;  %s832_s2 = smov [#allocation10]   ;;  %s78_s26 = int_to_ptr.hbm [resolvable:$true] %s77_s26 }
   0xe   :  { %55 = dma.hbm_to_vmem [thread:$0]  %s48_s20, 128, %s50_s0, [#allocation6], %s827_s13, %s827_s13, %s828_s14  }
   0xf   :  { %s79_s27 = sshll.u32 %s832_s2, 4  ;;  %s80_s27 = int_to_ptr.vmem [resolvable:$true] %s79_s27 }
  0x10   :  { %85 = dma.hbm_to_vmem [thread:$0]  %s78_s26, 192, %s80_s27, [#allocation9], %s827_s13, %s827_s13, %s828_s14  }
  0x11   :  { %818 = dma.done.wait [#allocation3], 320  }
  0x12   :  { %819 = vsyncadd [#allocation3], 4294966976 }
  0x13   :  { %820 = dma.done.wait [#allocation6], 448  }
  0x14   :  { %821 = vsyncadd [#allocation6], 4294966848 }
  0x15   :  { %822 = dma.done.wait [#allocation9], 384  }
  0x16   :  { %823 = vsyncadd [#allocation9], 4294966912  ;;  %v179_v0 = vld [vmem:[#allocation8 + $0x8] sm:$0xf]  ;;  %v640_v2 = vld [vmem:[#allocation7] sm:$0xff]  ;;  %vm216_vm0 = vcmask 1043456  }
  0x17   :  { %v202_v1 = vunpack.c.l.b16 %v179_v0  ;;  %v636_v3 = vld [vmem:[#allocation2] sm:$0xff]  ;;  %161 = vmatpush.bf16.msra.mxu0 %v640_v2  ;;  %vm144_vm1 = vcmask 130048   ;;  %v641_v6 = vld [vmem:[#allocation8] sm:$0xff]  ;;  %vm206_vm2 = vcmask 195584   ;;  %v637_v8 = vld [vmem:[#allocation2 + $0x8] sm:$0xff]  ;;  %vm300_vm3 = vcmask 261120  }
  0x18   :  { %v911_v7 = vld [vmem:[#allocation5] sm:$0xff]  ;;  %v916_v9 = vld [vmem:[#allocation5 + $0x8] sm:$0xff]  ;;  %v113_v10 = vld [vmem:[#allocation2 + $0x10] sm:$0xf]  ;;  %vm401_vm4 = vcmask 64512   ;;  %vm562_vm5 = vcmask 257024  }
  0x19   :  { %v204_v4 = vpack.c.b16 %v202_v1, %v202_v1  ;;  %v134_v11 = vunpack.c.l.b16 %v113_v10  ;;  %v118_v12 = vld [vmem:[#allocation5 + $0x10] sm:$0xf]  ;;  %v651_v17 = vld [vmem:[%s987_s5] ss:$0 sm:$0xff]  ;;  %s574_s12 = sshll.u32 %s990_s8, 4  ;;  %s575_s12 = int_to_ptr.hbm [resolvable:$true] %s574_s12 }
  0x1a   :  { %601 = vmatmul.msk.bf16.vlgmr.msra.gmra.mxu0 %vm144_vm1, %v636_v3  ;;  %v193_v14 = vunpack.c.l.b16 %v118_v12  ;;  %v652_v20 = vld [vmem:[%s985_s3] ss:$0 sm:$0xff]  ;;  %v245_v59 = vld [vmem:[#allocation10 + $0x8] sm:$0xf] }
  0x1b   :  { %v218_v5 = vsel %vm216_vm0, %v204_v4, 0  ;;  %v137_v13 = vpack.c.b16 %v134_v11, %v134_v11  ;;  %v255_v60 = vunpack.c.l.b16 %v245_v59  ;;  %v642_v63 = vld [vmem:[#allocation10] sm:$0xff] }
  0x1c   :  { %226 = vmatpush.bf16.msra.mxu1 %v218_v5  ;;  %v921_v15 = vpack.c.b16 %v193_v14, %v193_v14 }
  0x1d   :  { %v257_v61 = vpack.c.b16 %v255_v60, %v255_v60 }
  0x1f   :  { %v260_v62 = vsel %vm216_vm0, %v257_v61, 0 }
  0x20   :  { %227 = vmatpush.bf16.msra.mxu1 %v641_v6  ;;  %268 = vmatpush.bf16.msra.mxu2 %v260_v62 }
  0x23   :  { %616 = vmatmul.msk.bf16.vlgmr.msra.gmra.mxu1 %vm206_vm2, %v911_v7 }
  0x24   :  { %269 = vmatpush.bf16.msra.mxu2 %v642_v63 }
  0x27   :  { %623 = vmatmul.msk.bf16.vlgmr.msra.gmra.mxu2 %vm206_vm2, %v911_v7 }
  0x2a   :  { %602 = vmatmul.msk.bf16.gmra.mxu0 %vm144_vm1, %v637_v8 }
  0x33   :  { %617 = vmatmul.msk.bf16.gmra.mxu1 %vm206_vm2, %v916_v9 }
  0x37   :  { %624 = vmatmul.msk.bf16.gmra.mxu2 %vm206_vm2, %v916_v9 }
  0x3a   :  { %603 = vmatmul.msk.bf16.gmra.mxu0 %vm144_vm1, %v137_v13 }
  0x43   :  { %618 = vmatmul.msk.bf16.gmra.mxu1 %vm206_vm2, %v921_v15 }
  0x47   :  { %625 = vmatmul.msk.bf16.gmra.mxu2 %vm206_vm2, %v921_v15 }
  0x97   :  { %v163_v16 = vpop.f32.mrf.mxu0 }
  0x98   :  { %v164_v24 = vadd.f32 %v652_v20, %v163_v16 }
  0x9a   :  { %v285_v26 = vpack.c.bf16 %v164_v24, %v164_v24 }
  0x9f   :  { %v165_v21 = vpop.f32.mrf.mxu0 }
  0xa0   :  { %v229_v18 = vpop.f32.mrf.mxu1  ;;  %v166_v36 = vadd.f32 %v652_v20, %v165_v21 }
  0xa1   :  { %v230_v19 = vadd.f32 %v651_v17, %v229_v18 }
  0xa2   :  { %v286_v40 = vpack.c.bf16 %v166_v36, %v166_v36 }
  0xa3   :  { %v290_v22 = vpack.c.bf16 %v230_v19, %v230_v19 }
  0xa5   :  { %v305_v23 = vsel %vm300_vm3, %v290_v22, 0 }
  0xa6   :  { %314 = vmatpush.bf16.xpose.msra.mxu3 %v305_v23 }
  0xa7   :  { %v168_v28 = vpop.f32.mrf.mxu0 }
  0xa8   :  { %v231_v25 = vpop.f32.mrf.mxu1  ;;  %v169_v51 = vadd.f32 %v652_v20, %v168_v28 }
  0xa9   :  { %v232_v27 = vadd.f32 %v651_v17, %v231_v25 }
  0xaa   :  { %v287_v54 = vpack.c.bf16 %v169_v51, %v169_v51 }
  0xab   :  { %v291_v29 = vpack.c.bf16 %v232_v27, %v232_v27 }
  0xad   :  { %626 = vmatmul.msk.bf16.vlgmr.msra.gmra.mxu3 %vm300_vm3, %v285_v26  ;;  %v324_v30 = vsel %vm300_vm3, %v291_v29, 0 }
  0xae   :  { %333 = vmatpush.bf16.xpose.msrb.mxu3 %v324_v30 }
  0xaf   :  { %v170_v33 = vpop.f32.mrf.mxu0 }
  0xb0   :  { %v234_v31 = vpop.f32.mrf.mxu1  ;;  %v171_v43 = vadd.f32 %v652_v20, %v170_v33 }
  0xb1   :  { %v235_v32 = vadd.f32 %v651_v17, %v234_v31 }
  0xb2   :  { %v288_v47 = vpack.c.bf16 %v171_v43, %v171_v43 }
  0xb3   :  { %v292_v34 = vpack.c.bf16 %v235_v32, %v235_v32 }
  0xb5   :  { %v343_v35 = vsel %vm300_vm3, %v292_v34, 0 }
  0xb6   :  { %352 = vmatpush.bf16.xpose.msra.mxu3 %v343_v35 }
  0xb7   :  { %v173_v39 = vpop.f32.mrf.mxu0 }
  0xb8   :  { %v236_v37 = vpop.f32.mrf.mxu1  ;;  %v174_v50 = vadd.f32 %v652_v20, %v173_v39 }
  0xb9   :  { %v237_v38 = vadd.f32 %v651_v17, %v236_v37 }
  0xba   :  { %v289_v53 = vpack.c.bf16 %v174_v50, %v174_v50 }
  0xbb   :  { %v293_v41 = vpack.c.bf16 %v237_v38, %v237_v38 }
  0xbd   :  { %627 = vmatmul.msk.bf16.vlgmr.msrb.gmra.mxu3 %vm300_vm3, %v286_v40  ;;  %v362_v42 = vsel %vm300_vm3, %v293_v41, 0  ;;  %v271_v41 = vpop.f32.mrf.mxu2 }
  0xbe   :  { %371 = vmatpush.bf16.xpose.msrb.mxu0 %v362_v42  ;;  %v653_v42 = vld [vmem:[%s989_s7] ss:$0 sm:$0xff]  ;;  %s833_s7 = smov [#allocation11]  }
  0xbf   :  { %v175_v46 = vpop.f32.mrf.mxu0  ;;  %v272_v43 = vadd.f32 %v653_v42, %v271_v41  ;;  %s572_s9 = sshll.u32 %s833_s7, 4  ;;  %s573_s9 = int_to_ptr.vmem [resolvable:$true] %s572_s9 }
  0xc0   :  { %v239_v44 = vpop.f32.mrf.mxu1 }
  0xc1   :  { %v240_v45 = vadd.f32 %v651_v17, %v239_v44 }
  0xc3   :  { %v294_v48 = vpack.c.bf16 %v240_v45, %v240_v45  ;;  %v295_v45 = vpack.c.bf16 %v272_v43, %v272_v43 }
  0xc5   :  { %629 = vmatmul.msk.bf16.vlgmr.msrb.gmra.mxu0 %vm300_vm3, %v288_v47  ;;  %v381_v49 = vsel %vm300_vm3, %v294_v48, 0  ;;  %v273_v44 = vpop.f32.mrf.mxu2 }
  0xc6   :  { %390 = vmatpush.bf16.xpose.msrb.mxu1 %v381_v49  ;;  %v274_v46 = vadd.f32 %v653_v42, %v273_v44  ;;  %v466_v49 = vsel %vm216_vm0, %v295_v45, 0 }
  0xc7   :  { %475 = vmatpush.bf16.msrb.mxu2 %v466_v49 }
  0xc8   :  { %v241_v52 = vpop.f32.mrf.mxu1  ;;  %v296_v47 = vpack.c.bf16 %v274_v46, %v274_v46 }
  0xca   :  { %v485_v48 = vsel %vm216_vm0, %v296_v47, 0 }
  0xcb   :  { %494 = vmatpush.bf16.msrb.mxu3 %v485_v48 }
  0xcd   :  { %630 = vmatmul.msk.bf16.vlgmr.msrb.gmra.mxu1 %vm300_vm3, %v289_v53  ;;  %628 = vmatmul.msk.bf16.vlgmr.msra.gmra.mxu3 %vm300_vm3, %v287_v54  ;;  %v276_v50 = vpop.f32.mrf.mxu2 }
  0xce   :  { %v277_v51 = vadd.f32 %v653_v42, %v276_v50 }
  0xd0   :  { %v297_v52 = vpack.c.bf16 %v277_v51, %v277_v51 }
  0xd2   :  { %v504_v54 = vsel %vm216_vm0, %v297_v52, 0 }
  0xd3   :  { %513 = vmatpush.bf16.msra.mxu0 %v504_v54 }
  0xd5   :  { %v278_v53 = vpop.f32.mrf.mxu2 }
 0x130   :  { %v316_v55 = vpop.f32.mrf.mxu3 }
 0x131   :  { %v396_v56 = vmul.f32 0.17677669, %v316_v55  ;;  %v279_v55 = vadd.f32 %v653_v42, %v278_v53 }
 0x133   :  { %v402_v57 = vsel %vm401_vm4, %v396_v56, -inf }
 0x134   :  { %403 = vmax.xlane.f32.xlu0 %v402_v57 }
 0x138   :  { %v318_v58 = vpop.f32.mrf.mxu3 }
 0x139   :  { %v281_v58 = vpop.f32.mrf.mxu2 }
 0x13a   :  { %v282_v59 = vadd.f32 %v653_v42, %v281_v58 }
 0x13c   :  { %v299_v62 = vpack.c.bf16 %v282_v59, %v282_v59 }
 0x13e   :  { %v542_v63 = vsel %vm216_vm0, %v299_v62, 0 }
 0x13f   :  { %551 = vmatpush.bf16.msra.mxu2 %v542_v63 }
 0x140   :  { %v335_v0 = vpop.f32.mrf.mxu3 }
 0x141   :  { %v397_v1 = vmul.f32 0.17677669, %v335_v0  ;;  %v283_v60 = vpop.f32.mrf.mxu2 }
 0x142   :  { %v373_v2 = vpop.f32.mrf.mxu0 }
 0x143   :  { %v399_v3 = vmul.f32 0.17677669, %v373_v2  ;;  %v405_v4 = vsel %vm401_vm4, %v397_v1, -inf }
 0x144   :  { %406 = vmax.xlane.f32.xlu0 %v405_v4 }
 0x145   :  { %v411_v5 = vsel %vm401_vm4, %v399_v3, -inf }
 0x146   :  { %412 = vmax.xlane.f32.xlu2 %v411_v5 }
 0x148   :  { %v337_v6 = vpop.f32.mrf.mxu3 }
 0x14a   :  { %v392_v8 = vpop.f32.mrf.mxu1  ;;  %v375_v10 = vpop.f32.mrf.mxu0 }
 0x14b   :  { %v400_v11 = vmul.f32 0.17677669, %v392_v8 }
 0x14d   :  { %v414_v12 = vsel %vm401_vm4, %v400_v11, -inf }
 0x14e   :  { %415 = vmax.xlane.f32.xlu1 %v414_v12 }
 0x150   :  { %v354_v13 = vpop.f32.mrf.mxu3 }
 0x151   :  { %v398_v14 = vmul.f32 0.17677669, %v354_v13 }
 0x152   :  { %v394_v16 = vpop.f32.mrf.mxu1 }
 0x153   :  { %v408_v17 = vsel %vm401_vm4, %v398_v14, -inf }
 0x156   :  { %409 = vmax.xlane.f32.xlu1 %v408_v17 }
 0x158   :  { %v356_v18 = vpop.f32.mrf.mxu3 }
 0x1a7   :  { %v404_v7 = vpop.xlane.xlu0 %403 }
 0x1a8   :  { %v417_v19 = vsub.f32 %v396_v56, %v404_v7  ;;  %v298_v56 = vpack.c.bf16 %v279_v55, %v279_v55 }
 0x1aa   :  { %v422_v20 = vmul.f32 1.442695, %v417_v19  ;;  %v523_v57 = vsel %vm216_vm0, %v298_v56, 0 }
 0x1ab   :  { %532 = vmatpush.bf16.msra.mxu1 %v523_v57 }
 0x1ac   :  { %654 = vpow2.f32 %v422_v20 }
 0x1b2   :  { %v655_v21 = vpop.eup %654 }
 0x1b3   :  { %v432_v22 = vsel %vm401_vm4, %v655_v21, 0.0 }
 0x1b4   :  { %433 = vadd.xlane.f32.xlu2 %v432_v22 }
 0x1b7   :  { %v407_v23 = vpop.xlane.xlu0 %406 }
 0x1b8   :  { %v418_v24 = vsub.f32 %v397_v1, %v407_v23 }
 0x1b9   :  { %v413_v25 = vpop.xlane.xlu2 %412 }
 0x1ba   :  { %v424_v26 = vmul.f32 1.442695, %v418_v24  ;;  %v420_v27 = vsub.f32 %v399_v3, %v413_v25 }
 0x1bc   :  { %656 = vpow2.f32 %v424_v26  ;;  %v428_v9 = vmul.f32 1.442695, %v420_v27 }
 0x1be   :  { %658 = vpow2.f32 %v428_v9 }
 0x1c1   :  { %v416_v28 = vpop.xlane.xlu1 %415 }
 0x1c2   :  { %v657_v29 = vpop.eup %656  ;;  %v421_v30 = vsub.f32 %v400_v11, %v416_v28 }
 0x1c3   :  { %v435_v15 = vsel %vm401_vm4, %v657_v29, 0.0 }
 0x1c4   :  { %v430_v31 = vmul.f32 1.442695, %v421_v30  ;;  %436 = vadd.xlane.f32.xlu0 %v435_v15  ;;  %v659_v32 = vpop.eup %658 }
 0x1c5   :  { %v441_v35 = vsel %vm401_vm4, %v659_v32, 0.0 }
 0x1c6   :  { %660 = vpow2.f32 %v430_v31 }
 0x1c9   :  { %v410_v33 = vpop.xlane.xlu1 %409 }
 0x1ca   :  { %v419_v34 = vsub.f32 %v398_v14, %v410_v33 }
 0x1cc   :  { %v661_v36 = vpop.eup %660  ;;  %v426_v37 = vmul.f32 1.442695, %v419_v34  ;;  %442 = vadd.xlane.f32.xlu0 %v441_v35 }
 0x1cd   :  { %v444_v38 = vsel %vm401_vm4, %v661_v36, 0.0 }
 0x1ce   :  { %662 = vpow2.f32 %v426_v37  ;;  %445 = vadd.xlane.f32.xlu1 %v444_v38 }
 0x1d4   :  { %v663_v39 = vpop.eup %662 }
 0x1d5   :  { %v438_v40 = vsel %vm401_vm4, %v663_v39, 0.0 }
 0x1d6   :  { %439 = vadd.xlane.f32.xlu2 %v438_v40 }
 0x227   :  { %v434_v61 = vpop.xlane.xlu2 %433 }
 0x228   :  { %664 = vrcp.f32 %v434_v61 }
 0x22e   :  { %v665_v0 = vpop.eup %664 }
 0x22f   :  { %v452_v1 = vmul.f32 %v665_v0, %v655_v21 }
 0x231   :  { %v457_v2 = vpack.c.bf16 %v452_v1, %v452_v1 }
 0x233   :  { %631 = vmatmul.msk.bf16.vlgmr.msrb.gmra.mxu2 %vm401_vm4, %v457_v2 }
 0x237   :  { %v437_v3 = vpop.xlane.xlu0 %436 }
 0x238   :  { %666 = vrcp.f32 %v437_v3 }
 0x23e   :  { %v667_v4 = vpop.eup %666 }
 0x23f   :  { %v453_v5 = vmul.f32 %v667_v4, %v657_v29  ;;  %v443_v6 = vpop.xlane.xlu0 %442 }
 0x240   :  { %668 = vrcp.f32 %v443_v6 }
 0x241   :  { %v458_v8 = vpack.c.bf16 %v453_v5, %v453_v5  ;;  %v446_v10 = vpop.xlane.xlu1 %445 }
 0x242   :  { %670 = vrcp.f32 %v446_v10 }
 0x243   :  { %632 = vmatmul.msk.bf16.vlgmr.msrb.gmra.mxu3 %vm401_vm4, %v458_v8 }
 0x246   :  { %v669_v11 = vpop.eup %668 }
 0x247   :  { %v455_v12 = vmul.f32 %v669_v11, %v659_v32 }
 0x248   :  { %v671_v13 = vpop.eup %670 }
 0x249   :  { %v460_v14 = vpack.c.bf16 %v455_v12, %v455_v12  ;;  %v456_v16 = vmul.f32 %v671_v13, %v661_v36  ;;  %v440_v17 = vpop.xlane.xlu2 %439 }
 0x24a   :  { %672 = vrcp.f32 %v440_v17 }
 0x24b   :  { %v461_v18 = vpack.c.bf16 %v456_v16, %v456_v16  ;;  %634 = vmatmul.msk.bf16.vlgmr.msra.gmra.mxu1 %vm401_vm4, %v460_v14 }
 0x24d   :  { %635 = vmatmul.msk.bf16.vlgmr.msra.gmra.mxu2 %vm401_vm4, %v461_v18 }
 0x250   :  { %v673_v7 = vpop.eup %672 }
 0x251   :  { %v454_v19 = vmul.f32 %v673_v7, %v663_v39 }
 0x253   :  { %v459_v20 = vpack.c.bf16 %v454_v19, %v454_v19 }
 0x255   :  { %633 = vmatmul.msk.bf16.vlgmr.msra.gmra.mxu0 %vm401_vm4, %v459_v20 }
 0x2b6   :  { %v477_v21 = vpop.f32.mrf.mxu2 }
 0x2b7   :  { %v557_v22 = vpack.c.bf16 %v477_v21, %v477_v21 }
 0x2b9   :  { %563 = vst.msk [vmem:[#allocation11] sm:$0xf] %vm562_vm5, %v557_v22 }
 0x2be   :  { %v479_v23 = vpop.f32.mrf.mxu2 }
 0x2c6   :  { %v496_v24 = vpop.f32.mrf.mxu3 }
 0x2c7   :  { %v558_v25 = vpack.c.bf16 %v496_v24, %v496_v24 }
 0x2c8   :  { %v534_v26 = vpop.f32.mrf.mxu1 }
 0x2c9   :  { %564 = vst.msk [vmem:[#allocation11 + $0x4] sm:$0xf] %vm562_vm5, %v558_v25  ;;  %v560_v27 = vpack.c.bf16 %v534_v26, %v534_v26 }
 0x2cb   :  { %566 = vst.msk [vmem:[#allocation11 + $0xc] sm:$0xf] %vm562_vm5, %v560_v27 }
 0x2ce   :  { %v498_v9 = vpop.f32.mrf.mxu3 }
 0x2d0   :  { %v536_v28 = vpop.f32.mrf.mxu1  ;;  %v553_v29 = vpop.f32.mrf.mxu2 }
 0x2d1   :  { %v561_v30 = vpack.c.bf16 %v553_v29, %v553_v29 }
 0x2d2   :  { %v515_v15 = vpop.f32.mrf.mxu0 }
 0x2d3   :  { %567 = vst.msk [vmem:[#allocation11 + $0x10] sm:$0xf] %vm562_vm5, %v561_v30  ;;  %v559_v31 = vpack.c.bf16 %v515_v15, %v515_v15 }
 0x2d5   :  { %565 = vst.msk [vmem:[#allocation11 + $0x8] sm:$0xf] %vm562_vm5, %v559_v31 }
 0x2d6   :  { %580 = dma.vmem_to_hbm [thread:$0]  %s573_s9, 320, %s575_s12, [#allocation4], %s827_s13, %s827_s13, %s828_s14  }
 0x2d8   :  { %v555_v32 = vpop.f32.mrf.mxu2 }
 0x2da   :  { %v517_v33 = vpop.f32.mrf.mxu0 }
 0x2db   :  { %824 = dma.done.wait [#allocation4], 320  }
 0x2dc   :  { %825 = vsyncadd [#allocation4], 4294966976 }
 0x2dd   :  { %585 = vsyncpa [#allocation3], 1 }
 0x2de   :  { %586 = vsyncpa [#allocation6], 1 }
 0x2df   :  { %587 = vsyncpa [#allocation9], 1 }
 0x2e0   :  { %588 = vsyncpa [#allocation4], 1 }

</bundles_post_ra>
